<compile_context>
chip_gen: v5e
topology: v5e:2x2
jax: 0.10.0
libtpu: 0.0.40
codegen_flags: <defaults>
</compile_context>

<pallas_src>
import functools

import jax
import jax.numpy as jnp
import numpy as np
from jax.experimental import pallas as pl
from jax.experimental.pallas import tpu as pltpu


def _round_up(x, m):
    return (x + m - 1) // m * m


def _pad_dim(d):
    """Lane-dim padding: at least 128; prefer 256-alignment (v6e/v7x 2x256^2
    MXU) when the extra padding is <= 1/8 of the 128-aligned size."""
    d128 = _round_up(d, 128)
    d256 = _round_up(d, 256)
    return d256 if (d256 - d128) <= d128 // 8 else d128


def _pick_tile(dim, candidates):
    for c in candidates:
        if dim % c == 0:
            return c
    return dim


def _choose_tiles(M_pad, K_pad, N_pad):
    if M_pad % 128 == 0:
        tm = _pick_tile(M_pad, (512, 256, 128))
    else:
        tm = M_pad                      # small batch: full-extent M block
    tn = _pick_tile(N_pad, (512, 256, 128))
    tk = _pick_tile(K_pad, (1024, 512, 256, 128))
    # v7x megacore: ensure at least one "parallel" grid axis has >= 2 programs.
    if M_pad // tm == 1 and N_pad // tn < 2:
        for cand in (256, 128):
            if N_pad % cand == 0 and N_pad // cand >= 2:
                tn = cand
                break
    return tm, tn, tk


# -----------------------------------------------------------------------------
# Pallas kernel: tiled (M, K) @ (K, N) matmul, bf16 operands, f32 accumulation,
# bf16 output written only on the last K step.
# -----------------------------------------------------------------------------
def _matmul_kernel(x_ref, w_ref, o_ref, acc_ref):
    @pl.when(pl.program_id(2) == 0)
    def _():
        acc_ref[...] = jnp.zeros_like(acc_ref)

    acc_ref[...] += jnp.dot(x_ref[...], w_ref[...],
                            preferred_element_type=jnp.float32)

    @pl.when(pl.program_id(2) == pl.num_programs(2) - 1)
    def _():
        o_ref[...] = acc_ref[...].astype(o_ref.dtype)


def pallas_matmul(x, w, tm, tn, tk):
    """x: (M, K) bf16, w: (K, N) bf16 -> (M, N) bf16.  Dims divisible by tiles."""
    M, K = x.shape
    K2, N = w.shape
    assert K == K2
    grid = (M // tm, N // tn, K // tk)           # reduction axis last

    # Double-buffered bf16 inputs + bf16 output + f32 accumulator.
    footprint = (2 * (tm * tk + tk * tn) * 2
                 + 2 * tm * tn * 2
                 + tm * tn * 4)
    vmem_limit = int(min(48 * 1024 * 1024,
                         max(32 * 1024 * 1024, 4 * footprint)))

    return pl.pallas_call(
        _matmul_kernel,
        out_shape=jax.ShapeDtypeStruct((M, N), jnp.bfloat16),
        grid_spec=pltpu.PrefetchScalarGridSpec(
            num_scalar_prefetch=0,
            grid=grid,
            in_specs=[
                pl.BlockSpec((tm, tk), lambda i, j, k: (i, k)),
                # NOTE: if profiling shows exposed DMA on the weight stream at
                # small tm, sweep pipeline_mode=pl.Buffered(3) here.
                pl.BlockSpec((tk, tn), lambda i, j, k: (k, j)),
            ],
            out_specs=pl.BlockSpec((tm, tn), lambda i, j, k: (i, j)),
            scratch_shapes=[pltpu.VMEM((tm, tn), jnp.float32)],
        ),
        compiler_params=pltpu.CompilerParams(
            dimension_semantics=("parallel", "parallel", "arbitrary"),
            vmem_limit_bytes=vmem_limit,
        ),
    )(x, w)


# -----------------------------------------------------------------------------
# Parameter init / one-time weight preparation (plain JAX glue, off hot path).
# -----------------------------------------------------------------------------
def init_block_circulant(key, in_features, out_features, block_size):
    """Matches the module's __init__ shapes (xavier_uniform on (p, q, bs))."""
    p = in_features // block_size + (1 if in_features % block_size else 0)
    q = out_features // block_size + (1 if out_features % block_size else 0)
    fan_in = q * block_size
    fan_out = p * block_size
    bound = float(np.sqrt(6.0 / (fan_in + fan_out)))
    weight = jax.random.uniform(key, (p, q, block_size), jnp.float32,
                                minval=-bound, maxval=bound)
    # self.bias exists in the module but is never used in forward() -> skipped.
    return weight, p, q


def expand_circulant(weight, p, q, bs):
    """W_full[i*bs + m, j*bs + n] = weight[j, i, (n - m) % bs]."""
    if p != q:
        raise ValueError(
            "BlockCirculantLayer forward's FFT broadcast requires p == q "
            f"(got p={p}, q={q}).")
    m = jnp.arange(bs)
    n = jnp.arange(bs)
    idx = (n[None, :] - m[:, None]) % bs          # (m, n)
    circ = weight[:, :, idx]                      # (j, i, m, n)
    w_full = jnp.transpose(circ, (1, 2, 0, 3)).reshape(p * bs, q * bs)
    return w_full


def prepare_weight(weight, p, q, block_size, in_features):
    """One-time per-weight expansion: compact (p, q, bs) -> dense bf16
    (K_pad, N_pad) matrix with the reference's static left-pad of x folded in
    (its first `left_pad` rows only ever multiply zeros).  NOT the hot path."""
    bs = block_size
    w_full = expand_circulant(weight, p, q, bs)        # (p*bs, q*bs) f32
    left_pad = p * bs - in_features
    w_used = w_full[left_pad:, :]                      # (in_features, q*bs)
    K0, N0 = w_used.shape
    K_pad = _pad_dim(K0)
    N_pad = _pad_dim(N0)
    w_used = jnp.pad(w_used, ((0, K_pad - K0), (0, N_pad - N0)))
    return w_used.astype(jnp.bfloat16)


# -----------------------------------------------------------------------------
# Forward (hot path): right-pad/cast x, one tiled MXU matmul, truncate.
# Output is bf16 (MXU accumulates in f32); cast outside if f32 is required.
# -----------------------------------------------------------------------------
def block_circulant_forward(x, w_prepared, *, in_features, out_features,
                            force_pallas=False):
    K_pad, N_pad = w_prepared.shape
    x2 = x.reshape(-1, in_features)               # flatten leading dims (as torch)
    M = x2.shape[0]
    if M <= 256:
        M_pad = _round_up(max(M, 1), 16)          # bf16 sublane pack only
    else:
        M_pad = _round_up(M, 128)
    tm, tn, tk = _choose_tiles(M_pad, K_pad, N_pad)

    x2p = jnp.pad(x2.astype(jnp.bfloat16),
                  ((0, M_pad - M), (0, K_pad - in_features)))   # right-pad only

    grid = (M_pad // tm, N_pad // tn, K_pad // tk)
    if (not force_pallas) and grid == (1, 1, 1):
        # Tiny problems: pallas_call fixed overhead dominates; let XLA fuse.
        h = jnp.dot(x2p, w_prepared,
                    preferred_element_type=jnp.float32).astype(jnp.bfloat16)
    else:
        h = pallas_matmul(x2p, w_prepared, tm, tn, tk)           # (M_pad, N_pad) bf16
    return h[:M, :out_features]


# -----------------------------------------------------------------------------
# Pure-JAX FFT reference mirroring the PyTorch forward op-for-op.
# -----------------------------------------------------------------------------
def reference_forward(x, weight, in_features, out_features, block_size, p, q):
    bs = block_size
    pad = p * bs - in_features
    x2 = x.reshape(-1, in_features).astype(jnp.float32)
    x2 = jnp.pad(x2, ((0, 0), (pad, 0)))
    x3 = x2.reshape(-1, p, bs)
    xf = jnp.fft.rfft(x3)
    wf = jnp.fft.rfft(weight)
    xf = jnp.tile(xf[:, None, :, :], (1, q, 1, 1))
    hf = xf * wf                                   # same broadcast as torch (p == q)
    h = jnp.fft.irfft(hf, n=bs)
    h = jnp.sum(h, axis=2)
    h = h.reshape(-1, q * bs)
    return h[:, :out_features]


if __name__ == "__main__":
    # (batch, in_features, out_features, block_size); p == q in all cases.
    configs = [
        (6, 120, 128, 16),     # exercises left-pad folded into the weight
        (6, 128, 120, 16),     # exercises output truncation (q*bs > out_features)
        (96, 1152, 1152, 16),  # multi-step grid: K accumulation + parallel N axis
    ]

    key = jax.random.PRNGKey(0)
    for (batch, in_features, out_features, block_size) in configs:
        key, kw, kx = jax.random.split(key, 3)
        weight, p, q = init_block_circulant(kw, in_features, out_features,
                                            block_size)
        x = jax.random.normal(kx, (batch, in_features), dtype=jnp.float32)

        # One-time weight preparation (cached dense bf16 circulant expansion).
        w_prepared = jax.block_until_ready(
            prepare_weight(weight, p, q, block_size, in_features))

        # force_pallas=True so the Pallas kernel is exercised even for the
        # tiny demo shapes that the dispatcher would route to plain jnp.dot.
        fwd = jax.jit(functools.partial(
            block_circulant_forward, in_features=in_features,
            out_features=out_features, force_pallas=True))
        out = jax.block_until_ready(fwd(x, w_prepared))

        # Reference: f32 FFT path of the PyTorch module on bf16-rounded
        # operands (the kernel's operand precision; output is bf16 too).
        x_r = x.astype(jnp.bfloat16).astype(jnp.float32)
        w_r = weight.astype(jnp.bfloat16).astype(jnp.float32)
        ref = reference_forward(x_r, w_r, in_features, out_features,
                                block_size, p, q)
        np.testing.assert_allclose(np.asarray(out, dtype=np.float32),
                                   np.asarray(ref), rtol=2e-2, atol=2e-2)

    print("KERNEL_OK")
</pallas_src>

<mosaic_0001>
module attributes {stable_mosaic.version = 11 : i64} {
  func.func @_matmul_kernel(%arg0: i32, %arg1: i32, %arg2: i32, %arg3: memref<16x128xbf16, #tpu.memory_space<vmem>>, %arg4: memref<128x128xbf16, #tpu.memory_space<vmem>>, %arg5: memref<16x128xbf16, #tpu.memory_space<vmem>>, %arg6: memref<16x128xf32, #tpu.memory_space<vmem>>) attributes {dimension_semantics = [#tpu.dimension_semantics<parallel>, #tpu.dimension_semantics<parallel>, #tpu.dimension_semantics<arbitrary>], iteration_bounds = array<i64: 1, 1, 1>, scalar_prefetch = 0 : i64, scratch_operands = 1 : i64, tpu.core_type = #tpu.core_type<tc>, window_params = [{transform_indices = @transform_0, window_bounds = array<i64: 16, 128>}, {transform_indices = @transform_1, window_bounds = array<i64: 128, 128>}, {transform_indices = @transform_2, window_bounds = array<i64: 16, 128>}]} {
    %c0_i32 = arith.constant 0 : i32
    %0 = arith.cmpi eq, %arg2, %c0_i32 : i32
    %1 = arith.extui %0 : i1 to i32
    %c0_i32_0 = arith.constant 0 : i32
    %2 = arith.cmpi ne, %1, %c0_i32_0 : i32
    scf.if %2 {
      %cst_10 = arith.constant 0.000000e+00 : f32
      %12 = vector.broadcast %cst_10 : f32 to vector<16x128xf32>
      %c0_11 = arith.constant 0 : index
      %c0_12 = arith.constant 0 : index
      %13 = vector.load %arg6[%c0_11, %c0_12] : memref<16x128xf32, #tpu.memory_space<vmem>>, vector<16x128xf32>
      tpu.vector_store %arg6[%c0_11, %c0_12], %12 {strides = array<i32>} : memref<16x128xf32, #tpu.memory_space<vmem>>, vector<16x128xf32>,
    } else {
    }
    %c0 = arith.constant 0 : index
    %c0_1 = arith.constant 0 : index
    %3 = vector.load %arg6[%c0, %c0_1] : memref<16x128xf32, #tpu.memory_space<vmem>>, vector<16x128xf32>
    %c0_2 = arith.constant 0 : index
    %c0_3 = arith.constant 0 : index
    %4 = vector.load %arg3[%c0_2, %c0_3] : memref<16x128xbf16, #tpu.memory_space<vmem>>, vector<16x128xbf16>
    %c0_4 = arith.constant 0 : index
    %c0_5 = arith.constant 0 : index
    %5 = vector.load %arg4[%c0_4, %c0_5] : memref<128x128xbf16, #tpu.memory_space<vmem>>, vector<128x128xbf16>
    %cst = arith.constant dense<0.000000e+00> : vector<16x128xf32>
    %6 = tpu.matmul %4, %5, %cst {dimension_numbers = #tpu.dot_dimension_numbers<[1], [0], [0], [1], [0, 0, 1, 1], [], []>} : vector<16x128xbf16>, vector<128x128xbf16>, vector<16x128xf32> -> vector<16x128xf32>
    %7 = arith.addf %3, %6 : vector<16x128xf32>
    %c0_6 = arith.constant 0 : index
    %c0_7 = arith.constant 0 : index
    %8 = vector.load %arg6[%c0_6, %c0_7] : memref<16x128xf32, #tpu.memory_space<vmem>>, vector<16x128xf32>
    tpu.vector_store %arg6[%c0_6, %c0_7], %7 {strides = array<i32>} : memref<16x128xf32, #tpu.memory_space<vmem>>, vector<16x128xf32>,
    %c0_i32_8 = arith.constant 0 : i32
    %9 = arith.cmpi eq, %arg2, %c0_i32_8 : i32
    %10 = arith.extui %9 : i1 to i32
    %c0_i32_9 = arith.constant 0 : i32
    %11 = arith.cmpi ne, %10, %c0_i32_9 : i32
    scf.if %11 {
      %c0_10 = arith.constant 0 : index
      %c0_11 = arith.constant 0 : index
      %12 = vector.load %arg6[%c0_10, %c0_11] : memref<16x128xf32, #tpu.memory_space<vmem>>, vector<16x128xf32>
      %13 = arith.truncf %12 : vector<16x128xf32> to vector<16x128xbf16>
      %c0_12 = arith.constant 0 : index
      %c0_13 = arith.constant 0 : index
      %14 = vector.load %arg5[%c0_12, %c0_13] : memref<16x128xbf16, #tpu.memory_space<vmem>>, vector<16x128xbf16>
      tpu.vector_store %arg5[%c0_12, %c0_13], %13 {strides = array<i32>} : memref<16x128xbf16, #tpu.memory_space<vmem>>, vector<16x128xbf16>,
    } else {
    }
    return
  }
  func.func @transform_0(%arg0: i32, %arg1: i32, %arg2: i32) -> (i32, i32) {
    %c0_i32 = arith.constant 0 : i32
    return %arg0, %arg2 : i32, i32
  }
  func.func @transform_1(%arg0: i32, %arg1: i32, %arg2: i32) -> (i32, i32) {
    %c0_i32 = arith.constant 0 : i32
    return %arg2, %arg1 : i32, i32
  }
  func.func @transform_2(%arg0: i32, %arg1: i32, %arg2: i32) -> (i32, i32) {
    %c0_i32 = arith.constant 0 : i32
    return %arg0, %arg1 : i32, i32
  }
}

</mosaic_0001>

<bundles_post_ra>
// kernel: block_circulant_forward.1
= control target key start
LH: loop header
LB: loop body
LE: loop exit
PB: predicated region body
PF: predicated region fallthrough
CT: control target
= control target key end

     0   :  { %7 = vsyncpa [#allocation4], 0  ;;  %s218_s12 = smov [#allocation3]   ;;  %s219_s14 = smov 64   ;;  %s245_s0 = inlined_call_operand.vmem [shape: bf16[16,128], index: 0, kind: input, shape index: {}]   ;;  %s246_s1 = inlined_call_operand.hbm [shape: bf16[128,128], index: 1, kind: input, shape index: {}]   ;;  %s247_s2 = inlined_call_operand.vmem [shape: bf16[16,128], index: 2, kind: output, shape index: {}]  }
   0x1   :  { %s14_s11 = sshll.u32 %s246_s1, 4  ;;  %s16_s13 = sshll.u32 %s218_s12, 4  ;;  %s15_s11 = int_to_ptr.hbm [resolvable:$true] %s14_s11  ;;  %s17_s13 = int_to_ptr.vmem [resolvable:$true] %s16_s13 }
   0x2   :  { %s220_s15 = smov 4  }
   0x3   :  { %22 = dma.hbm_to_vmem [thread:$0]  %s15_s11, 1024, %s17_s13, [#allocation4], %s219_s14, %s219_s14, %s220_s15  }
   0x4   :  { %216 = dma.done.wait [#allocation4], 1024  }
   0x5   :  { %217 = vsyncadd [#allocation4], 4294966272  ;;  %v183_v0 = vld [vmem:[#allocation3 + $0x38] sm:$0xff]  ;;  %v182_v1 = vld [vmem:[#allocation3 + $0x30] sm:$0xff] }
   0x6   :  { %107 = vmatpush.bf16.msra.mxu0 %v183_v0  ;;  %v181_v2 = vld [vmem:[#allocation3 + $0x28] sm:$0xff]  ;;  %v180_v3 = vld [vmem:[#allocation3 + $0x20] sm:$0xff]  ;;  %v179_v4 = vld [vmem:[#allocation3 + $0x18] sm:$0xff] }
   0x7   :  { %v178_v5 = vld [vmem:[#allocation3 + $0x10] sm:$0xff]  ;;  %v177_v6 = vld [vmem:[#allocation3 + $0x8] sm:$0xff]  ;;  %v176_v7 = vld [vmem:[#allocation3] sm:$0xff] }
   0x8   :  { %v175_v8 = vld [vmem:[%s245_s0] sm:$0xff] }
   0xa   :  { %108 = vmatpush.bf16.msra.mxu0 %v182_v1 }
   0xe   :  { %109 = vmatpush.bf16.msra.mxu0 %v181_v2 }
  0x12   :  { %110 = vmatpush.bf16.msra.mxu0 %v180_v3 }
  0x16   :  { %111 = vmatpush.bf16.msra.mxu0 %v179_v4 }
  0x1a   :  { %112 = vmatpush.bf16.msra.mxu0 %v178_v5 }
  0x1e   :  { %113 = vmatpush.bf16.msra.mxu0 %v177_v6 }
  0x22   :  { %114 = vmatpush.bf16.msra.mxu0 %v176_v7 }
  0x25   :  { %115 = vmatmul.bf16.vlgmr.msra.gmra.mxu0 %v175_v8 }
  0xa2   :  { %v116_v9 = vpop.f32.mrf.mxu0 }
  0xaa   :  { %v118_v10 = vpop.f32.mrf.mxu0 }
  0xab   :  { %v187_v11 = vpack.c.bf16 %v118_v10, %v116_v9 }
  0xad   :  { %188 = vst [vmem:[%s247_s2] sm:$0xff] %v187_v11  }
  0xae   :  { %138 = vsyncpa [#allocation4], 1 }

</bundles_post_ra>
